<compile_context>
chip_gen: v5e
topology: v5e:2x2
jax: 0.10.0
libtpu: 0.0.40
codegen_flags: <defaults>
</compile_context>

<pallas_src>
import functools

import jax
import jax.numpy as jnp
from jax import lax
from jax.experimental import pallas as pl
from jax.experimental.pallas import tpu as pltpu


# ----------------------------------------------------------------------------
# Generation-aware VMEM budget / tile preferences
# ----------------------------------------------------------------------------

def _default_vmem_limit():
    cap = 128 * 1024 * 1024
    try:
        info = pltpu.get_tpu_info()
        cap = int(getattr(info, "vmem_capacity_bytes", cap))
    except Exception:
        pass
    # Leave ~half of physical VMEM for compiler-internal scratch / double buffers:
    # v5e/v6e (128 MiB) -> 64 MiB scoped, v7x (64 MiB) -> 32 MiB scoped.
    return int(min(64 * 1024 * 1024, max(32 * 1024 * 1024, cap // 2)))


_VMEM_LIMIT = _default_vmem_limit()
# Wider N/K tiles on big-VMEM parts (v5e/v6e) to amortize the ~0.35 us/grid-step
# overhead; keep 512 on v7x.  TODO(synk): add pl.Buffered(3) on weight BlockSpecs
# for v6e once the grid along the weight axis has >= 3 steps.
_TN_PREF = 1024 if _VMEM_LIMIT >= 48 * 1024 * 1024 else 512


def _pick_tile(n, pref):
    """Largest multiple-of-128 tile <= pref dividing n.

    Falls back to the full dimension (a legal full-extent block) when n is not a
    multiple of 128; this keeps the grid valid at the cost of a bigger block.
    """
    if n <= pref or n % 128 != 0:
        return n
    t = pref - (pref % 128)
    while t >= 128:
        if n % t == 0:
            return t
        t -= 128
    return n


def _pick_m_tile(t, pref):
    """Largest multiple-of-8 row tile <= pref dividing t (or t itself)."""
    if t <= pref:
        return t
    cand = pref - (pref % 8)
    while cand >= 8:
        if t % cand == 0:
            return cand
        cand -= 8
    return t


# ----------------------------------------------------------------------------
# Pallas kernels
# ----------------------------------------------------------------------------

def _add_norm_matmul_kernel(x_ref, r_ref, nw_ref, w_ref, o_ref, res_ref, xn_ref, *, eps):
    # vLLM fused add-RMSNorm: residual_out = x + residual; out = rmsnorm(residual_out),
    # fused with the following projection.  The norm is computed exactly once per
    # M tile (at the first N step) and cached in a bf16 VMEM scratch.
    @pl.when(pl.program_id(1) == 0)
    def _():
        s = x_ref[...].astype(jnp.float32) + r_ref[...].astype(jnp.float32)
        res_ref[...] = s.astype(res_ref.dtype)
        var = jnp.mean(s * s, axis=-1, keepdims=True)
        xn_ref[...] = (s * lax.rsqrt(var + eps)
                       * nw_ref[...].astype(jnp.float32)).astype(jnp.bfloat16)

    o_ref[...] = jnp.dot(xn_ref[...], w_ref[...],
                         preferred_element_type=jnp.float32).astype(o_ref.dtype)


def _silu_matmul_kernel(g_ref, u_ref, w_ref, o_ref, acc_ref):
    # SiluAndMul fused into the down_proj K-tiles: act = silu(gate)*up per K tile,
    # accumulated in an f32 VMEM scratch.
    @pl.when(pl.program_id(1) == 0)
    def _():
        acc_ref[...] = jnp.zeros_like(acc_ref)

    g = g_ref[...].astype(jnp.float32)
    u = u_ref[...].astype(jnp.float32)
    act = (g * lax.logistic(g) * u).astype(jnp.bfloat16)
    acc_ref[...] += jnp.dot(act, w_ref[...], preferred_element_type=jnp.float32)

    @pl.when(pl.program_id(1) == pl.num_programs(1) - 1)
    def _():
        o_ref[...] = acc_ref[...].astype(o_ref.dtype)


def _cross_guide_kernel(we_ref, nw_ref, w_ref, o_ref, *, eps):
    # kv_norm + (v_proj @ o_proj precombined) of HATGuideVectorAdd in one kernel.
    x = we_ref[...].astype(jnp.float32)
    var = jnp.mean(x * x, axis=-1, keepdims=True)
    xn = (x * lax.rsqrt(var + eps) * nw_ref[...].astype(jnp.float32)).astype(jnp.bfloat16)
    o_ref[...] = jnp.dot(xn, w_ref[...],
                         preferred_element_type=jnp.float32).astype(o_ref.dtype)


def _attn_oproj_kernel(q_ref, k_ref, v_ref, cosq_ref, sinq_ref, cosk_ref, sink_ref,
                       wo_ref, o_ref, acc_ref, *, scale, d, tq):
    # Grid = (q_tiles, num_heads).  One query head per grid step (bounded live
    # ranges); k/v blocks are the single KV head of this head's group (no repeat,
    # and Pallas skips the re-DMA while the block index is unchanged).  The o_proj
    # partials for every head accumulate into acc_ref and are written once.
    # TODO(synk): switch to a KV-tiled online-softmax (flash) variant once the
    # sequence length exceeds a few hundred tokens (dense (tq, T) scores + full-T
    # K/V blocks do not scale).
    qt = pl.program_id(0)
    h = pl.program_id(1)

    @pl.when(h == 0)
    def _():
        acc_ref[...] = jnp.zeros_like(acc_ref)

    def rope(x, cos, sinr):   # neox rotate_half via lane roll (XLU slot)
        return x * cos + pltpu.roll(x, shift=d // 2, axis=1) * sinr

    # Softmax scale folded into q: T*d VPU ops instead of T*T per head.
    q = (rope(q_ref[...].astype(jnp.float32), cosq_ref[...], sinq_ref[...])
         * scale).astype(jnp.bfloat16)
    k = rope(k_ref[...].astype(jnp.float32), cosk_ref[...], sink_ref[...]).astype(jnp.bfloat16)
    v = v_ref[...]                                            # bf16

    T = k.shape[0]
    q0 = qt * tq
    row = lax.broadcasted_iota(jnp.int32, (tq, T), 0) + q0
    col = lax.broadcasted_iota(jnp.int32, (tq, T), 1)
    bias = jnp.where(col <= row, jnp.float32(0.0), jnp.float32(-1e30))

    # Contract last dims directly (no k.T / XLU transpose).
    s = lax.dot_general(q, k, (((1,), (1,)), ((), ())),
                        preferred_element_type=jnp.float32) + bias
    m = jnp.max(s, axis=-1, keepdims=True)
    p = jnp.exp(s - m)
    l_inv = pl.reciprocal(jnp.sum(p, axis=-1, keepdims=True), approx=True)  # EUP slot
    o_h = jnp.dot(p.astype(jnp.bfloat16), v,
                  preferred_element_type=jnp.float32) * l_inv
    # Fused o_proj: accumulate o_h @ Wo[h*d:(h+1)*d, :] (no [T, nh*d] HBM round-trip).
    acc_ref[...] += jnp.dot(o_h.astype(jnp.bfloat16), wo_ref[...],
                            preferred_element_type=jnp.float32)

    @pl.when(h == pl.num_programs(1) - 1)
    def _():
        o_ref[...] = acc_ref[...].astype(o_ref.dtype)


# ----------------------------------------------------------------------------
# Pallas wrappers
# ----------------------------------------------------------------------------

def fused_add_norm_matmul(x, residual, norm_w, w, eps, tn_pref=None, tm_pref=256):
    """(out, new_residual) = (rmsnorm(x + residual) @ w, x + residual)."""
    T, H = x.shape
    H2, N = w.shape
    assert H == H2
    tn = _pick_tile(N, tn_pref or _TN_PREF)
    tm = _pick_m_tile(T, tm_pref)
    # TODO(synk): add K tiling + f32 accumulator for configs with H beyond ~2k
    # (v7x 64 MiB VMEM); the full-K weight block is fine at these sizes.
    return pl.pallas_call(
        functools.partial(_add_norm_matmul_kernel, eps=eps),
        out_shape=(jax.ShapeDtypeStruct((T, N), x.dtype),
                   jax.ShapeDtypeStruct((T, H), x.dtype)),
        grid=(T // tm, N // tn),
        in_specs=[pl.BlockSpec((tm, H), lambda m, n: (m, 0)),
                  pl.BlockSpec((tm, H), lambda m, n: (m, 0)),
                  pl.BlockSpec((1, H), lambda m, n: (0, 0)),
                  pl.BlockSpec((H, tn), lambda m, n: (0, n))],
        out_specs=(pl.BlockSpec((tm, tn), lambda m, n: (m, n)),
                   pl.BlockSpec((tm, H), lambda m, n: (m, 0))),
        scratch_shapes=[pltpu.VMEM((tm, H), jnp.bfloat16)],
        compiler_params=pltpu.CompilerParams(
            dimension_semantics=("parallel", "arbitrary"),
            vmem_limit_bytes=_VMEM_LIMIT),
    )(x, residual, norm_w, w)


def fused_silu_matmul(gate_up, w_down, tk_pref=None, tm_pref=256):
    """down_proj(silu(gate) * up) with the activation fused into the K-tiles."""
    T, two_i = gate_up.shape
    inter = two_i // 2
    inter2, H = w_down.shape
    assert inter == inter2
    tk = _pick_tile(inter, tk_pref or _TN_PREF)
    n_k = inter // tk
    tm = _pick_m_tile(T, tm_pref)
    return pl.pallas_call(
        _silu_matmul_kernel,
        out_shape=jax.ShapeDtypeStruct((T, H), gate_up.dtype),
        grid=(T // tm, n_k),
        in_specs=[pl.BlockSpec((tm, tk), lambda m, k: (m, k)),            # gate K-tile
                  pl.BlockSpec((tm, tk), lambda m, k: (m, k + n_k)),      # up K-tile
                  pl.BlockSpec((tk, H), lambda m, k: (k, 0))],
        out_specs=pl.BlockSpec((tm, H), lambda m, k: (m, 0)),
        scratch_shapes=[pltpu.VMEM((tm, H), jnp.float32)],
        compiler_params=pltpu.CompilerParams(
            dimension_semantics=("parallel", "arbitrary"),
            vmem_limit_bytes=_VMEM_LIMIT),
    )(gate_up, gate_up, w_down)


def cross_guide_vector(word_embeddings, kv_norm_w, w_vo, eps):
    """HATGuideVectorAdd core: rmsnorm(word_embeddings) @ (Wv @ Wo)."""
    W, Hkv = word_embeddings.shape
    Hkv2, Hq = w_vo.shape
    assert Hkv == Hkv2
    return pl.pallas_call(
        functools.partial(_cross_guide_kernel, eps=eps),
        out_shape=jax.ShapeDtypeStruct((W, Hq), word_embeddings.dtype),
        grid=(1,),
        in_specs=[pl.BlockSpec((W, Hkv), lambda i: (0, 0)),
                  pl.BlockSpec((1, Hkv), lambda i: (0, 0)),
                  pl.BlockSpec((Hkv, Hq), lambda i: (0, 0))],
        out_specs=pl.BlockSpec((W, Hq), lambda i: (0, 0)),
        compiler_params=pltpu.CompilerParams(
            dimension_semantics=("arbitrary",),
            vmem_limit_bytes=_VMEM_LIMIT),
    )(word_embeddings, kv_norm_w, w_vo)


def causal_attention_oproj(qkv, cos, sin_rot, wo, *, num_heads, num_kv_heads,
                           head_dim, hidden_size, tq_pref=256):
    """Fused RoPE + causal GQA attention + o_proj.

    qkv: [T, (nh + 2*nkv) * d] fused projection output (passed three times with
    column-offset BlockSpecs so q/k/v are never sliced / materialized in HBM).
    Returns o_proj(attention) of shape [T, hidden_size].
    """
    T = qkv.shape[0]
    rep = num_heads // num_kv_heads
    d = head_dim
    # TODO(synk): for head_dim < 128 pack several heads per lane block.
    assert d % 128 == 0
    assert wo.shape == (num_heads * d, hidden_size)
    tq = _pick_m_tile(T, tq_pref)
    nq = T // tq
    scale = d ** -0.5

    return pl.pallas_call(
        functools.partial(_attn_oproj_kernel, scale=scale, d=d, tq=tq),
        out_shape=jax.ShapeDtypeStruct((T, hidden_size), qkv.dtype),
        grid=(nq, num_heads),
        in_specs=[
            # q columns of head h
            pl.BlockSpec((tq, d), lambda qt, h: (qt, h)),
            # k / v columns of this head's KV group (GQA: no repeat)
            pl.BlockSpec((T, d), lambda qt, h: (0, num_heads + h // rep)),
            pl.BlockSpec((T, d), lambda qt, h: (0, num_heads + num_kv_heads + h // rep)),
            # RoPE tables: q-tile rows for q, full rows for k
            pl.BlockSpec((tq, d), lambda qt, h: (qt, 0)),
            pl.BlockSpec((tq, d), lambda qt, h: (qt, 0)),
            pl.BlockSpec((T, d), lambda qt, h: (0, 0)),
            pl.BlockSpec((T, d), lambda qt, h: (0, 0)),
            # o_proj weight rows of head h
            pl.BlockSpec((d, hidden_size), lambda qt, h: (h, 0)),
        ],
        out_specs=pl.BlockSpec((tq, hidden_size), lambda qt, h: (qt, 0)),
        scratch_shapes=[pltpu.VMEM((tq, hidden_size), jnp.float32)],
        compiler_params=pltpu.CompilerParams(
            dimension_semantics=("parallel", "arbitrary"),
            vmem_limit_bytes=_VMEM_LIMIT),
    )(qkv, qkv, qkv, cos, sin_rot, cos, sin_rot, wo)


# ----------------------------------------------------------------------------
# HATDecoderLayer forward (glue in plain JAX, hot paths in Pallas)
# ----------------------------------------------------------------------------

def neox_rope_tables(positions, head_dim, rope_theta):
    inv_freq = 1.0 / (rope_theta ** (jnp.arange(0, head_dim, 2, dtype=jnp.float32)
                                     / head_dim))
    freqs = positions.astype(jnp.float32)[:, None] * inv_freq[None, :]   # [T, d/2]
    cos = jnp.concatenate([jnp.cos(freqs), jnp.cos(freqs)], axis=-1)     # [T, d]
    sin = jnp.sin(freqs)
    # Sign folded into the table so rotate_half == pltpu.roll(x, d//2) * sin_rot.
    sin_rot = jnp.concatenate([-sin, sin], axis=-1)                      # [T, d]
    return cos, sin_rot


def hat_transformer_layer(positions, hidden_states, residual, p, cfg):
    eps = cfg["rms_norm_eps"]
    nh, nkv, d = cfg["num_heads"], cfg["num_kv_heads"], cfg["head_dim"]
    H = cfg["hidden_size"]

    # input_layernorm (fused add-RMSNorm) fused with the QKV projection.
    qkv, residual = fused_add_norm_matmul(hidden_states, residual,
                                          p["input_ln_w"], p["qkv_w"], eps)

    # RoPE + causal GQA attention + o_proj in one kernel (q/k/v read straight out
    # of the fused QKV activation via BlockSpec column offsets).
    cos, sin_rot = neox_rope_tables(positions, d, cfg["rope_theta"])
    hidden_states = causal_attention_oproj(qkv, cos, sin_rot, p["attn_o_w"],
                                           num_heads=nh, num_kv_heads=nkv,
                                           head_dim=d, hidden_size=H)

    # post_attention_layernorm fused with gate_up projection.
    gate_up, residual = fused_add_norm_matmul(hidden_states, residual,
                                              p["post_ln_w"], p["gate_up_w"], eps)

    # SiluAndMul fused with down projection.
    hidden_states = fused_silu_matmul(gate_up, p["down_w"])
    return hidden_states, residual


def hat_decoder_layer(positions, hidden_states, residual, word_lens_bytes,
                      predictive_word_embeddings, p, cfg):
    eps = cfg["rms_norm_eps"]
    T = hidden_states.shape[0]

    # query_norm: only its residual output is live (HATGuideVectorAdd overwrites the
    # normalized query), so the dead normalization kernel is skipped entirely.
    if residual is None:
        residual = hidden_states
    else:
        residual = hidden_states + residual

    # kv_norm + single precombined (Wv @ Wo) matmul in one kernel.
    cross_out = cross_guide_vector(predictive_word_embeddings, p["kv_norm_w"],
                                   p["cross_vo_w"], eps)

    # repeat_interleave along dim 0 by word_lens_bytes (caller guarantees
    # sum(word_lens_bytes) == T, matching torch.repeat_interleave).
    # TODO(synk): absorb this gather into the QKV kernel via scalar-prefetched
    # per-token word indices (PrefetchScalarGridSpec) or an in-kernel one-hot
    # matmul; at per-token grid granularity the ~0.35us/step overhead currently
    # outweighs the saved [T, Hq] HBM round-trip for short sequences.
    hidden_states = jnp.repeat(cross_out, word_lens_bytes, axis=0,
                               total_repeat_length=T)                    # [T, Hq]

    return hat_transformer_layer(positions, hidden_states, residual, p, cfg)


# ----------------------------------------------------------------------------
# Parameter init + example run
# ----------------------------------------------------------------------------

def init_params(key, cfg):
    H = cfg["hidden_size"]
    Hkv = cfg["hidden_size_kv"]
    Hq = cfg["hidden_size_q"]
    Hx = cfg["cross_hidden_size"]
    nh, nkv, d = cfg["num_heads"], cfg["num_kv_heads"], cfg["head_dim"]
    inter = cfg["intermediate_size"]

    keys = jax.random.split(key, 10)
    s = 0.02

    def w(k, shape):  # matmul weights stored bf16 (MXU-native), [in, out]
        return (jax.random.normal(k, shape, jnp.float32) * s).astype(jnp.bfloat16)

    def nw(k, n):     # norm weights kept f32
        return 1.0 + 0.01 * jax.random.normal(k, (1, n), jnp.float32)

    cross_v_w = w(keys[2], (Hkv, Hx))
    cross_o_w = w(keys[3], (Hx, Hq))
    # Exact fusion of v_proj followed by o_proj (no nonlinearity in between):
    # precombine in f32 and cast once to bf16.
    cross_vo_w = jnp.dot(cross_v_w.astype(jnp.float32),
                         cross_o_w.astype(jnp.float32)).astype(jnp.bfloat16)

    return {
        # query_norm weight kept for parity with the module; its normalization is
        # dead compute in this layer and never executed.
        "query_norm_w": nw(keys[0], H),
        "kv_norm_w": nw(keys[1], Hkv),
        "cross_v_w": cross_v_w,
        "cross_o_w": cross_o_w,
        "cross_vo_w": cross_vo_w,
        "input_ln_w": nw(keys[4], H),
        "post_ln_w": nw(keys[5], H),
        "qkv_w": w(keys[6], (H, (nh + 2 * nkv) * d)),
        "attn_o_w": w(keys[7], (nh * d, H)),
        "gate_up_w": w(keys[8], (H, 2 * inter)),
        "down_w": w(keys[9], (inter, H)),
    }


if __name__ == "__main__":
    cfg = {
        "hidden_size": 512,          # byte-level decoder hidden size (== hidden_size_q)
        "hidden_size_q": 512,
        "hidden_size_kv": 256,       # word-level embedding size
        "cross_hidden_size": 256,    # cross_attention_config.hidden_size
        "num_heads": 4,
        "num_kv_heads": 2,
        "head_dim": 128,
        "intermediate_size": 1024,
        "rms_norm_eps": 1e-6,
        "rope_theta": 10000.0,
    }

    T = 16                           # total byte tokens
    W = 4                            # number of words
    word_lens_list = [3, 5, 2, 6]
    assert sum(word_lens_list) == T  # torch repeat_interleave invariant

    key = jax.random.PRNGKey(0)
    k_h, k_w, k_p = jax.random.split(key, 3)

    hidden_states = jax.random.normal(
        k_h, (T, cfg["hidden_size"]), jnp.float32).astype(jnp.bfloat16)
    predictive_word_embeddings = jax.random.normal(
        k_w, (W, cfg["hidden_size_kv"]), jnp.float32).astype(jnp.bfloat16)
    word_lens_bytes = jnp.array(word_lens_list, dtype=jnp.int32)
    positions = jnp.arange(T, dtype=jnp.int32)
    residual = None                  # first layer: residual-is-None path

    params = init_params(k_p, cfg)

    out_hidden, out_residual = hat_decoder_layer(
        positions, hidden_states, residual, word_lens_bytes,
        predictive_word_embeddings, params, cfg)

    jax.block_until_ready(out_hidden)
    jax.block_until_ready(out_residual)

    assert out_hidden.shape == (T, cfg["hidden_size"])
    assert out_residual.shape == (T, cfg["hidden_size"])
    assert out_hidden.dtype == jnp.bfloat16
    print("KERNEL_OK")
</pallas_src>

<mosaic_0001>
module attributes {stable_mosaic.version = 11 : i64} {
  func.func @_cross_guide_kernel(%arg0: i32, %arg1: memref<4x256xbf16, #tpu.memory_space<vmem>>, %arg2: memref<1x256xf32, #tpu.memory_space<vmem>>, %arg3: memref<256x512xbf16, #tpu.memory_space<vmem>>, %arg4: memref<4x512xbf16, #tpu.memory_space<vmem>>) attributes {dimension_semantics = [#tpu.dimension_semantics<arbitrary>], iteration_bounds = array<i64: 1>, scalar_prefetch = 0 : i64, scratch_operands = 0 : i64, tpu.core_type = #tpu.core_type<tc>, window_params = [{pipeline_mode = #tpu.pipeline_mode<synchronous>, transform_indices = @transform_0, window_bounds = array<i64: 4, 256>}, {pipeline_mode = #tpu.pipeline_mode<synchronous>, transform_indices = @transform_1, window_bounds = array<i64: 1, 256>}, {pipeline_mode = #tpu.pipeline_mode<synchronous>, transform_indices = @transform_2, window_bounds = array<i64: 256, 512>}, {pipeline_mode = #tpu.pipeline_mode<synchronous>, transform_indices = @transform_3, window_bounds = array<i64: 4, 512>}]} {
    %c0 = arith.constant 0 : index
    %c0_0 = arith.constant 0 : index
    %0 = vector.load %arg1[%c0, %c0_0] : memref<4x256xbf16, #tpu.memory_space<vmem>>, vector<4x256xbf16>
    %1 = arith.extf %0 : vector<4x256xbf16> to vector<4x256xf32>
    %2 = arith.mulf %1, %1 : vector<4x256xf32>
    %cst = arith.constant dense<0.000000e+00> : vector<4xf32>
    %3 = vector.multi_reduction <add>, %2, %cst [1] : vector<4x256xf32> to vector<4xf32>
    %4 = vector.shape_cast %3 : vector<4xf32> to vector<4x1xf32>
    %cst_1 = arith.constant 2.560000e+02 : f32
    %5 = vector.broadcast %cst_1 : f32 to vector<4x1xf32>
    %6 = arith.divf %4, %5 : vector<4x1xf32>
    %cst_2 = arith.constant 9.99999997E-7 : f32
    %7 = vector.broadcast %cst_2 : f32 to vector<4x1xf32>
    %8 = arith.addf %6, %7 : vector<4x1xf32>
    %9 = math.rsqrt %8 : vector<4x1xf32>
    %10 = vector.broadcast %9 : vector<4x1xf32> to vector<4x256xf32>
    %11 = arith.mulf %1, %10 : vector<4x256xf32>
    %c0_3 = arith.constant 0 : index
    %c0_4 = arith.constant 0 : index
    %12 = vector.load %arg2[%c0_3, %c0_4] : memref<1x256xf32, #tpu.memory_space<vmem>>, vector<1x256xf32>
    %13 = vector.broadcast %12 : vector<1x256xf32> to vector<4x256xf32>
    %14 = arith.mulf %11, %13 : vector<4x256xf32>
    %15 = arith.truncf %14 : vector<4x256xf32> to vector<4x256xbf16>
    %c0_5 = arith.constant 0 : index
    %c0_6 = arith.constant 0 : index
    %16 = vector.load %arg3[%c0_5, %c0_6] : memref<256x512xbf16, #tpu.memory_space<vmem>>, vector<256x512xbf16>
    %cst_7 = arith.constant dense<0.000000e+00> : vector<4x512xf32>
    %17 = tpu.matmul %15, %16, %cst_7 {dimension_numbers = #tpu.dot_dimension_numbers<[1], [0], [0], [1], [0, 0, 1, 1], [], []>} : vector<4x256xbf16>, vector<256x512xbf16>, vector<4x512xf32> -> vector<4x512xf32>
    %18 = arith.truncf %17 : vector<4x512xf32> to vector<4x512xbf16>
    %c0_8 = arith.constant 0 : index
    %c0_9 = arith.constant 0 : index
    %19 = vector.load %arg4[%c0_8, %c0_9] : memref<4x512xbf16, #tpu.memory_space<vmem>>, vector<4x512xbf16>
    tpu.vector_store %arg4[%c0_8, %c0_9], %18 {strides = array<i32>} : memref<4x512xbf16, #tpu.memory_space<vmem>>, vector<4x512xbf16>,
    return
  }
  func.func @transform_0(%arg0: i32) -> (i32, i32) {
    %c0_i32 = arith.constant 0 : i32
    %c0_i32_0 = arith.constant 0 : i32
    %c0_i32_1 = arith.constant 0 : i32
    return %c0_i32, %c0_i32_0 : i32, i32
  }
  func.func @transform_1(%arg0: i32) -> (i32, i32) {
    %c0_i32 = arith.constant 0 : i32
    %c0_i32_0 = arith.constant 0 : i32
    %c0_i32_1 = arith.constant 0 : i32
    return %c0_i32, %c0_i32_0 : i32, i32
  }
  func.func @transform_2(%arg0: i32) -> (i32, i32) {
    %c0_i32 = arith.constant 0 : i32
    %c0_i32_0 = arith.constant 0 : i32
    %c0_i32_1 = arith.constant 0 : i32
    return %c0_i32, %c0_i32_0 : i32, i32
  }
  func.func @transform_3(%arg0: i32) -> (i32, i32) {
    %c0_i32 = arith.constant 0 : i32
    %c0_i32_0 = arith.constant 0 : i32
    %c0_i32_1 = arith.constant 0 : i32
    return %c0_i32, %c0_i32_0 : i32, i32
  }
}

</mosaic_0001>

<bundles_post_ra>
// kernel: tpu_custom_call.1
= control target key start
LH: loop header
LB: loop body
LE: loop exit
PB: predicated region body
PF: predicated region fallthrough
CT: control target
= control target key end

     0   :  { %8 = vsyncpa [#allocation3], 0  ;;  %s1134_s0 = inlined_call_operand.hbm [shape: bf16[4,256], index: 0, kind: input, shape index: {}]   ;;  %s1135_s1 = inlined_call_operand.hbm [shape: f32[1,256], index: 1, kind: input, shape index: {}]   ;;  %s1136_s2 = inlined_call_operand.hbm [shape: bf16[256,512], index: 2, kind: input, shape index: {}]   ;;  %s1137_s3 = inlined_call_operand.hbm [shape: bf16[4,512], index: 3, kind: output, shape index: {}]  }
   0x1   :  { %9 = vsyncpa [#allocation6], 0  ;;  %s27_s14 = sshll.u32 %s1135_s1, 4  ;;  %s28_s14 = int_to_ptr.hbm [resolvable:$true] %s27_s14 }
   0x2   :  { %10 = vsyncpa [#allocation4], 0  ;;  %s1073_s15 = smov [#allocation5]   ;;  %s16_s19 = sshll.u32 %s1134_s0, 4  ;;  %s17_s19 = int_to_ptr.hbm [resolvable:$true] %s16_s19 }
   0x3   :  { %s29_s16 = sshll.u32 %s1073_s15, 4  ;;  %s1074_s20 = smov [#allocation2]   ;;  %s30_s16 = int_to_ptr.vmem [resolvable:$true] %s29_s16 }
   0x4   :  { %32 = dma.hbm_to_vmem [thread:$0]  %s28_s14, 32, %s30_s16, [#allocation6]  }
   0x5   :  { %s18_s21 = sshll.u32 %s1074_s20, 4  ;;  %s37_s24 = sshll.u32 %s1136_s2, 4  ;;  %s19_s21 = int_to_ptr.vmem [resolvable:$true] %s18_s21  ;;  %s38_s24 = int_to_ptr.hbm [resolvable:$true] %s37_s24 }
   0x6   :  { %21 = dma.hbm_to_vmem [thread:$0]  %s17_s19, 64, %s19_s21, [#allocation3]  }
   0x7   :  { %s1075_s1 = smov [#allocation7]   ;;  %s1076_s26 = smov 256  }
   0x8   :  { %s39_s25 = sshll.u32 %s1075_s1, 4  ;;  %s1077_s27 = smov 16   ;;  %s40_s25 = int_to_ptr.vmem [resolvable:$true] %s39_s25 }
   0x9   :  { %45 = dma.hbm_to_vmem [thread:$0]  %s38_s24, 8192, %s40_s25, [#allocation6], %s1076_s26, %s1076_s26, %s1077_s27  }
   0xa   :  { %1067 = dma.done.wait [#allocation3], 64  }
   0xb   :  { %1068 = vsyncadd [#allocation3], 4294967232 }
   0xc   :  { %1069 = dma.done.wait [#allocation6], 8224  }
   0xd   :  { %1070 = vsyncadd [#allocation6], 4294959072  ;;  %v58_v0 = vld [vmem:[#allocation2] sm:$0xf]  ;;  %v753_v1 = vld [vmem:[#allocation7 + $0xe0] sm:$0xf] }
   0xe   :  { %v1110_v2 = vunpack.c.l.bf16 %v58_v0  ;;  %v925_v3 = vld [vmem:[#allocation7 + $0xec] sm:$0xf0]  ;;  %v881_v4 = vld [vmem:[#allocation7 + $0x1e0] sm:$0xf]  ;;  %v923_v7 = vld [vmem:[#allocation7 + $0xe4] sm:$0xf] }
   0xf   :  { %v754_v5 = vor.u32 %v925_v3, %v753_v1  ;;  %v957_v6 = vld [vmem:[#allocation7 + $0x1ec] sm:$0xf0]  ;;  %v755_v8 = vld [vmem:[#allocation7 + $0xf0] sm:$0xf0]  ;;  %v955_v12 = vld [vmem:[#allocation7 + $0x1e4] sm:$0xf] }
  0x10   :  { %v60_v9 = vmul.f32 %v1110_v2, %v1110_v2  ;;  %v882_v10 = vor.u32 %v957_v6, %v881_v4  ;;  %v758_v11 = vor.u32 %v923_v7, %v755_v8  ;;  %v883_v13 = vld [vmem:[#allocation7 + $0x1f0] sm:$0xf0]  ;;  %v737_v15 = vld [vmem:[#allocation7 + $0xc0] sm:$0xf]  ;;  %v921_v16 = vld [vmem:[#allocation7 + $0xcc] sm:$0xf0] }
  0x11   :  { %499 = vmatpush.bf16.msra.mxu0 %v754_v5  ;;  %v886_v14 = vor.u32 %v955_v12, %v883_v13  ;;  %v865_v17 = vld [vmem:[#allocation7 + $0x1c0] sm:$0xf]  ;;  %v738_v18 = vor.u32 %v921_v16, %v737_v15  ;;  %v953_v19 = vld [vmem:[#allocation7 + $0x1cc] sm:$0xf0]  ;;  %v919_v20 = vld [vmem:[#allocation7 + $0xc4] sm:$0xf] }
  0x12   :  { %62 = vst [vmem:[#allocation1] ss:$2 sm:$0xff] %v60_v9  ;;  %512 = vmatpush.bf16.msra.mxu1 %v882_v10  ;;  %525 = vmatpush.bf16.msra.mxu2 %v758_v11  ;;  %v866_v21 = vor.u32 %v953_v19, %v865_v17  ;;  %v739_v22 = vld [vmem:[#allocation7 + $0xd0] sm:$0xf0]  ;;  %v951_v23 = vld [vmem:[#allocation7 + $0x1c4] sm:$0xf] }
  0x13   :  { %538 = vmatpush.bf16.msra.mxu3 %v886_v14  ;;  %v867_v24 = vld [vmem:[#allocation7 + $0x1d0] sm:$0xf0]  ;;  %v742_v25 = vor.u32 %v919_v20, %v739_v22  ;;  %vm67_vm0 = vcmask 1043456   ;;  %v721_v32 = vld [vmem:[#allocation7 + $0xa0] sm:$0xf]  ;;  %v1078_v47 = vmov 256.0  }
  0x14   :  { %v870_v26 = vor.u32 %v951_v23, %v867_v24  ;;  %v917_v33 = vld [vmem:[#allocation7 + $0xac] sm:$0xf0]  ;;  %v849_v34 = vld [vmem:[#allocation7 + $0x1a0] sm:$0xf]  ;;  %v915_v37 = vld [vmem:[#allocation7 + $0xa4] sm:$0xf]  ;;  %967 = vrcp.f32 %v1078_v47 }
  0x15   :  { %500 = vmatpush.bf16.msra.mxu0 %v738_v18  ;;  %v722_v35 = vor.u32 %v917_v33, %v721_v32  ;;  %v949_v36 = vld [vmem:[#allocation7 + $0x1ac] sm:$0xf0]  ;;  %v723_v38 = vld [vmem:[#allocation7 + $0xb0] sm:$0xf0]  ;;  %v947_v41 = vld [vmem:[#allocation7 + $0x1a4] sm:$0xf] }
  0x16   :  { %513 = vmatpush.bf16.msra.mxu1 %v866_v21  ;;  %526 = vmatpush.bf16.msra.mxu2 %v742_v25  ;;  %v850_v39 = vor.u32 %v949_v36, %v849_v34  ;;  %v726_v40 = vor.u32 %v915_v37, %v723_v38  ;;  %v851_v42 = vld [vmem:[#allocation7 + $0x1b0] sm:$0xf0]  ;;  %v705_v44 = vld [vmem:[#allocation7 + $0x80] sm:$0xf]  ;;  %v913_v45 = vld [vmem:[#allocation7 + $0x8c] sm:$0xf0] }
  0x17   :  { %539 = vmatpush.bf16.msra.mxu3 %v870_v26  ;;  %v854_v43 = vor.u32 %v947_v41, %v851_v42  ;;  %v833_v46 = vld [vmem:[#allocation7 + $0x180] sm:$0xf]  ;;  %v706_v48 = vor.u32 %v913_v45, %v705_v44  ;;  %v945_v49 = vld [vmem:[#allocation7 + $0x18c] sm:$0xf0]  ;;  %v911_v50 = vld [vmem:[#allocation7 + $0x84] sm:$0xf] }
  0x18   :  { %v707_v51 = vld [vmem:[#allocation7 + $0x90] sm:$0xf0]  ;;  %v834_v52 = vor.u32 %v945_v49, %v833_v46  ;;  %v943_v54 = vld [vmem:[#allocation7 + $0x184] sm:$0xf]  ;;  %v689_v57 = vld [vmem:[#allocation7 + $0x60] sm:$0xf] }
  0x19   :  { %v63_v27 = vld.sshfl [vmem:[#allocation1] sm:$0xff pattern:$0x75316420]  ;;  %v64_v28 = vld.sshfl [vmem:[#allocation1 + $0x8] sm:$0xff pattern:$0x75316420]  ;;  %501 = vmatpush.bf16.msra.mxu0 %v722_v35  ;;  %v710_v53 = vor.u32 %v911_v50, %v707_v51 }
  0x1a   :  { %v68_v29 = vsel %vm67_vm0, %v63_v27, 0.0  ;;  %v69_v30 = vsel %vm67_vm0, %v64_v28, 0.0  ;;  %514 = vmatpush.bf16.msra.mxu1 %v850_v39  ;;  %527 = vmatpush.bf16.msra.mxu2 %v726_v40  ;;  %v835_v55 = vld [vmem:[#allocation7 + $0x190] sm:$0xf0]  ;;  %v909_v58 = vld [vmem:[#allocation7 + $0x6c] sm:$0xf0]  ;;  %v1116_v5 = vpop.eup %967 }
  0x1b   :  { %v70_v31 = vadd.f32 %v69_v30, %v68_v29  ;;  %540 = vmatpush.bf16.msra.mxu3 %v854_v43  ;;  %v838_v56 = vor.u32 %v943_v54, %v835_v55  ;;  %v817_v59 = vld [vmem:[#allocation7 + $0x160] sm:$0xf]  ;;  %v690_v60 = vor.u32 %v909_v58, %v689_v57  ;;  %v941_v61 = vld [vmem:[#allocation7 + $0x16c] sm:$0xf0]  ;;  %v907_v62 = vld [vmem:[#allocation7 + $0x64] sm:$0xf]  ;;  %vm78_vm1 = vweird.f32 %v1116_v5 }
  0x1c   :  { %v691_v63 = vld [vmem:[#allocation7 + $0x70] sm:$0xf0]  ;;  %v818_v0 = vor.u32 %v941_v61, %v817_v59  ;;  %v939_v3 = vld [vmem:[#allocation7 + $0x164] sm:$0xf]  ;;  %v673_v7 = vld [vmem:[#allocation7 + $0x40] sm:$0xf] }
  0x1d   :  { %71 = vadd.xlane.f32.xlu0 %v70_v31  ;;  %502 = vmatpush.bf16.msra.mxu0 %v706_v48  ;;  %v694_v1 = vor.u32 %v907_v62, %v691_v63  ;;  %v819_v4 = vld [vmem:[#allocation7 + $0x170] sm:$0xf0]  ;;  %v905_v8 = vld [vmem:[#allocation7 + $0x4c] sm:$0xf0]  ;;  %v801_v9 = vld [vmem:[#allocation7 + $0x140] sm:$0xf] }
  0x1e   :  { %515 = vmatpush.bf16.msra.mxu1 %v834_v52  ;;  %528 = vmatpush.bf16.msra.mxu2 %v710_v53  ;;  %v822_v6 = vor.u32 %v939_v3, %v819_v4  ;;  %v674_v10 = vor.u32 %v905_v8, %v673_v7  ;;  %v937_v11 = vld [vmem:[#allocation7 + $0x14c] sm:$0xf0]  ;;  %v903_v12 = vld [vmem:[#allocation7 + $0x44] sm:$0xf]  ;;  %v675_v13 = vld [vmem:[#allocation7 + $0x50] sm:$0xf0] }
  0x1f   :  { %541 = vmatpush.bf16.msra.mxu3 %v838_v56  ;;  %v74_v14 = vmul.f32 256.0, %v1116_v5  ;;  %v802_v15 = vor.u32 %v937_v11, %v801_v9  ;;  %v678_v16 = vor.u32 %v903_v12, %v675_v13  ;;  %v935_v17 = vld [vmem:[#allocation7 + $0x144] sm:$0xf]  ;;  %v803_v18 = vld [vmem:[#allocation7 + $0x150] sm:$0xf0]  ;;  %vm610_vm5 = vcmask 1041408  }
  0x20   :  { %v806_v19 = vor.u32 %v935_v17, %v803_v18  ;;  %v657_v20 = vld [vmem:[#allocation7 + $0x20] sm:$0xf]  ;;  %v901_v21 = vld [vmem:[#allocation7 + $0x2c] sm:$0xf0]  ;;  %v899_v25 = vld [vmem:[#allocation7 + $0x24] sm:$0xf] }
  0x21   :  { %503 = vmatpush.bf16.msra.mxu0 %v690_v60  ;;  %v785_v22 = vld [vmem:[#allocation7 + $0x120] sm:$0xf]  ;;  %v658_v23 = vor.u32 %v901_v21, %v657_v20  ;;  %v933_v24 = vld [vmem:[#allocation7 + $0x12c] sm:$0xf0]  ;;  %v659_v26 = vld [vmem:[#allocation7 + $0x30] sm:$0xf0] }
  0x22   :  { %516 = vmatpush.bf16.msra.mxu1 %v818_v0  ;;  %529 = vmatpush.bf16.msra.mxu2 %v694_v1  ;;  %v75_v27 = vsub.f32 1.0, %v74_v14  ;;  %v786_v28 = vor.u32 %v933_v24, %v785_v22  ;;  %v662_v29 = vor.u32 %v899_v25, %v659_v26  ;;  %v931_v30 = vld [vmem:[#allocation7 + $0x124] sm:$0xf]  ;;  %v787_v31 = vld [vmem:[#allocation7 + $0x130] sm:$0xf0]  ;;  %vm614_vm6 = vcmask 1045508  }
  0x23   :  { %542 = vmatpush.bf16.msra.mxu3 %v822_v6  ;;  %v790_v32 = vor.u32 %v931_v30, %v787_v31  ;;  %v641_v33 = vld [vmem:[#allocation7] sm:$0xf]  ;;  %v897_v34 = vld [vmem:[#allocation7 + $0xc] sm:$0xf0]  ;;  %v895_v38 = vld [vmem:[#allocation7 + $0x4] sm:$0xf] }
  0x24   :  { %v769_v35 = vld [vmem:[#allocation7 + $0x100] sm:$0xf]  ;;  %v642_v36 = vor.u32 %v897_v34, %v641_v33  ;;  %v929_v37 = vld [vmem:[#allocation7 + $0x10c] sm:$0xf0]  ;;  %v643_v39 = vld [vmem:[#allocation7 + $0x10] sm:$0xf0]  ;;  %v76_v40 = vmul.f32 %v1116_v5, %v75_v27 }
  0x25   :  { %504 = vmatpush.bf16.msra.mxu0 %v674_v10  ;;  %v770_v41 = vor.u32 %v929_v37, %v769_v35  ;;  %v646_v42 = vor.u32 %v895_v38, %v643_v39  ;;  %v927_v43 = vld [vmem:[#allocation7 + $0x104] sm:$0xf]  ;;  %v771_v44 = vld [vmem:[#allocation7 + $0x110] sm:$0xf0]  ;;  %v761_v45 = vld [vmem:[#allocation7 + $0xe8] sm:$0xf] }
  0x26   :  { %517 = vmatpush.bf16.msra.mxu1 %v802_v15  ;;  %530 = vmatpush.bf16.msra.mxu2 %v678_v16  ;;  %v774_v46 = vor.u32 %v927_v43, %v771_v44  ;;  %v926_v47 = vld [vmem:[#allocation7 + $0xf4] sm:$0xf0]  ;;  %v889_v48 = vld [vmem:[#allocation7 + $0x1e8] sm:$0xf]  ;;  %v924_v52 = vld [vmem:[#allocation7 + $0xec] sm:$0xf]  ;;  %v77_v59 = vadd.f32 %v1116_v5, %v76_v40 }
  0x27   :  { %543 = vmatpush.bf16.msra.mxu3 %v806_v19  ;;  %v958_v49 = vld [vmem:[#allocation7 + $0x1f4] sm:$0xf0]  ;;  %v762_v50 = vor.u32 %v926_v47, %v761_v45  ;;  %v763_v53 = vld [vmem:[#allocation7 + $0xf8] sm:$0xf0]  ;;  %v956_v54 = vld [vmem:[#allocation7 + $0x1ec] sm:$0xf] }
  0x28   :  { %v890_v51 = vor.u32 %v958_v49, %v889_v48  ;;  %v766_v55 = vor.u32 %v924_v52, %v763_v53  ;;  %v891_v56 = vld [vmem:[#allocation7 + $0x1f8] sm:$0xf0]  ;;  %v745_v57 = vld [vmem:[#allocation7 + $0xc8] sm:$0xf]  ;;  %v922_v58 = vld [vmem:[#allocation7 + $0xd4] sm:$0xf0]  ;;  %v79_v12 = vsel %vm78_vm1, %v1116_v5, %v77_v59 }
  0x29   :  { %505 = vmatpush.bf16.msra.mxu0 %v658_v23  ;;  %v894_v60 = vor.u32 %v956_v54, %v891_v56  ;;  %v746_v61 = vor.u32 %v922_v58, %v745_v57  ;;  %v873_v62 = vld [vmem:[#allocation7 + $0x1c8] sm:$0xf]  ;;  %v954_v63 = vld [vmem:[#allocation7 + $0x1d4] sm:$0xf0]  ;;  %v920_v0 = vld [vmem:[#allocation7 + $0xcc] sm:$0xf] }
  0x2a   :  { %518 = vmatpush.bf16.msra.mxu1 %v786_v28  ;;  %531 = vmatpush.bf16.msra.mxu2 %v662_v29  ;;  %v874_v1 = vor.u32 %v954_v63, %v873_v62  ;;  %v747_v3 = vld [vmem:[#allocation7 + $0xd8] sm:$0xf0]  ;;  %v952_v4 = vld [vmem:[#allocation7 + $0x1cc] sm:$0xf]  ;;  %v729_v9 = vld [vmem:[#allocation7 + $0xa8] sm:$0xf] }
  0x2b   :  { %544 = vmatpush.bf16.msra.mxu3 %v790_v32  ;;  %v875_v6 = vld [vmem:[#allocation7 + $0x1d8] sm:$0xf0]  ;;  %v750_v7 = vor.u32 %v920_v0, %v747_v3  ;;  %v918_v10 = vld [vmem:[#allocation7 + $0xb4] sm:$0xf0]  ;;  %v857_v11 = vld [vmem:[#allocation7 + $0x1a8] sm:$0xf] }
  0x2c   :  { %v878_v8 = vor.u32 %v952_v4, %v875_v6  ;;  %v730_v13 = vor.u32 %v918_v10, %v729_v9  ;;  %v950_v14 = vld [vmem:[#allocation7 + $0x1b4] sm:$0xf0]  ;;  %v916_v15 = vld [vmem:[#allocation7 + $0xac] sm:$0xf]  ;;  %v731_v16 = vld [vmem:[#allocation7 + $0xb8] sm:$0xf0] }
  0x2d   :  { %506 = vmatpush.bf16.msra.mxu0 %v642_v36  ;;  %v858_v17 = vor.u32 %v950_v14, %v857_v11  ;;  %v734_v18 = vor.u32 %v916_v15, %v731_v16  ;;  %v948_v19 = vld [vmem:[#allocation7 + $0x1ac] sm:$0xf]  ;;  %v859_v20 = vld [vmem:[#allocation7 + $0x1b8] sm:$0xf0]  ;;  %v713_v21 = vld [vmem:[#allocation7 + $0x88] sm:$0xf] }
  0x2e   :  { %519 = vmatpush.bf16.msra.mxu1 %v770_v41  ;;  %532 = vmatpush.bf16.msra.mxu2 %v646_v42  ;;  %v862_v23 = vor.u32 %v948_v19, %v859_v20  ;;  %v914_v24 = vld [vmem:[#allocation7 + $0x94] sm:$0xf0]  ;;  %v841_v25 = vld [vmem:[#allocation7 + $0x188] sm:$0xf]  ;;  %v912_v5 = vld [vmem:[#allocation7 + $0x8c] sm:$0xf] }
  0x2f   :  { %545 = vmatpush.bf16.msra.mxu3 %v774_v46  ;;  %v946_v26 = vld [vmem:[#allocation7 + $0x194] sm:$0xf0]  ;;  %v715_v28 = vld [vmem:[#allocation7 + $0x98] sm:$0xf0]  ;;  %v944_v29 = vld [vmem:[#allocation7 + $0x18c] sm:$0xf]  ;;  %v714_v30 = vor.u32 %v914_v24, %v713_v21 }
  0x30   :  { %v842_v31 = vor.u32 %v946_v26, %v841_v25  ;;  %v843_v32 = vld [vmem:[#allocation7 + $0x198] sm:$0xf0]  ;;  %v718_v34 = vor.u32 %v912_v5, %v715_v28  ;;  %v697_v36 = vld [vmem:[#allocation7 + $0x68] sm:$0xf]  ;;  %v910_v37 = vld [vmem:[#allocation7 + $0x74] sm:$0xf0] }
  0x31   :  { %551 = vmatpush.bf16.msrb.mxu0 %v762_v50  ;;  %v846_v35 = vor.u32 %v944_v29, %v843_v32  ;;  %v825_v38 = vld [vmem:[#allocation7 + $0x168] sm:$0xf]  ;;  %v698_v39 = vor.u32 %v910_v37, %v697_v36  ;;  %v942_v40 = vld [vmem:[#allocation7 + $0x174] sm:$0xf0]  ;;  %v908_v41 = vld [vmem:[#allocation7 + $0x6c] sm:$0xf] }
  0x32   :  { %564 = vmatpush.bf16.msrb.mxu1 %v890_v51  ;;  %577 = vmatpush.bf16.msrb.mxu2 %v766_v55  ;;  %v699_v42 = vld [vmem:[#allocation7 + $0x78] sm:$0xf0]  ;;  %v826_v43 = vor.u32 %v942_v40, %v825_v38  ;;  %v940_v45 = vld [vmem:[#allocation7 + $0x16c] sm:$0xf]  ;;  %v681_v47 = vld [vmem:[#allocation7 + $0x48] sm:$0xf] }
  0x33   :  { %590 = vmatpush.bf16.msrb.mxu3 %v894_v60  ;;  %v702_v44 = vor.u32 %v908_v41, %v699_v42  ;;  %v827_v46 = vld [vmem:[#allocation7 + $0x178] sm:$0xf0]  ;;  %v906_v49 = vld [vmem:[#allocation7 + $0x54] sm:$0xf0]  ;;  %v809_v50 = vld [vmem:[#allocation7 + $0x148] sm:$0xf] }
  0x34   :  { %v830_v48 = vor.u32 %v940_v45, %v827_v46  ;;  %v938_v51 = vld [vmem:[#allocation7 + $0x154] sm:$0xf0]  ;;  %v682_v52 = vor.u32 %v906_v49, %v681_v47  ;;  %v904_v54 = vld [vmem:[#allocation7 + $0x4c] sm:$0xf]  ;;  %v683_v55 = vld [vmem:[#allocation7 + $0x58] sm:$0xf0] }
  0x35   :  { %552 = vmatpush.bf16.msrb.mxu0 %v746_v61  ;;  %v810_v53 = vor.u32 %v938_v51, %v809_v50  ;;  %v936_v56 = vld [vmem:[#allocation7 + $0x14c] sm:$0xf]  ;;  %v686_v58 = vor.u32 %v904_v54, %v683_v55  ;;  %v811_v59 = vld [vmem:[#allocation7 + $0x158] sm:$0xf0]  ;;  %v665_v60 = vld [vmem:[#allocation7 + $0x28] sm:$0xf] }
  0x36   :  { %565 = vmatpush.bf16.msrb.mxu1 %v874_v1  ;;  %578 = vmatpush.bf16.msrb.mxu2 %v750_v7  ;;  %v902_v61 = vld [vmem:[#allocation7 + $0x34] sm:$0xf0]  ;;  %v814_v63 = vor.u32 %v936_v56, %v811_v59  ;;  %v793_v0 = vld [vmem:[#allocation7 + $0x128] sm:$0xf]  ;;  %v900_v3 = vld [vmem:[#allocation7 + $0x2c] sm:$0xf] }
  0x37   :  { %591 = vmatpush.bf16.msrb.mxu3 %v878_v8  ;;  %v934_v1 = vld [vmem:[#allocation7 + $0x134] sm:$0xf0]  ;;  %v99_v4 = vld [vmem:[#allocation5] sm:$0x3]  ;;  %v932_v7 = vld [vmem:[#allocation7 + $0x12c] sm:$0xf]  ;;  %v666_v9 = vor.u32 %v902_v61, %v665_v60 }
  0x38   :  { %v667_v6 = vld [vmem:[#allocation7 + $0x38] sm:$0xf0]  ;;  %v794_v10 = vor.u32 %v934_v1, %v793_v0  ;;  %v898_v16 = vld [vmem:[#allocation7 + $0x14] sm:$0xf0]  ;;  %v102_v19 = vperm.slane %v99_v4, 1  ;;  %v101_v28 = vperm.slane %v99_v4, 0 }
  0x39   :  { %553 = vmatpush.bf16.msrb.mxu0 %v730_v13  ;;  %v795_v11 = vld [vmem:[#allocation7 + $0x138] sm:$0xf0]  ;;  %v1079_v13 = vmov 839922192   ;;  %v670_v15 = vor.u32 %v900_v3, %v667_v6  ;;  %v928_v24 = vld [vmem:[#allocation7 + $0x10c] sm:$0xf] }
  0x3a   :  { %566 = vmatpush.bf16.msrb.mxu1 %v858_v17  ;;  %579 = vmatpush.bf16.msrb.mxu2 %v734_v18  ;;  %v94_v14 = vunpack.c.l.s4 %v1079_v13  ;;  %v777_v17 = vld [vmem:[#allocation7 + $0x108] sm:$0xf]  ;;  %v930_v18 = vld [vmem:[#allocation7 + $0x114] sm:$0xf0]  ;;  %v798_v21 = vor.u32 %v932_v7, %v795_v11  ;;  %v779_v25 = vld [vmem:[#allocation7 + $0x118] sm:$0xf0] }
  0x3b   :  { %592 = vmatpush.bf16.msrb.mxu3 %v862_v23  ;;  %v651_v23 = vld [vmem:[#allocation7 + $0x18] sm:$0xf0]  ;;  %v778_v5 = vor.u32 %v930_v18, %v777_v17  ;;  %s1080_s0 = smov [#allocation8]   ;;  %s628_s30 = sshll.u32 %s1137_s3, 4  ;;  %s629_s30 = int_to_ptr.hbm [resolvable:$true] %s628_s30 }
  0x3c   :  { %v95_v29 = vunpack.c.0.s8 %v94_v14  ;;  %s626_s2 = sshll.u32 %s1080_s0, 4  ;;  %s627_s2 = int_to_ptr.vmem [resolvable:$true] %s626_s2 }
  0x3d   :  { %554 = vmatpush.bf16.msrb.mxu0 %v714_v30 }
  0x3e   :  { %567 = vmatpush.bf16.msrb.mxu1 %v842_v31  ;;  %580 = vmatpush.bf16.msrb.mxu2 %v718_v34  ;;  %v103_v31 = vrot.slane %v102_v19, 4  ;;  %v782_v34 = vor.u32 %v928_v24, %v779_v25 }
  0x3f   :  { %593 = vmatpush.bf16.msrb.mxu3 %v846_v35 }
  0x40   :  { %v104_v37 = vsel %vm67_vm0, %v101_v28, %v103_v31 }
  0x41   :  { %555 = vmatpush.bf16.msrb.mxu0 %v698_v39 }
  0x42   :  { %568 = vmatpush.bf16.msrb.mxu1 %v826_v43  ;;  %581 = vmatpush.bf16.msrb.mxu2 %v702_v44 }
  0x43   :  { %594 = vmatpush.bf16.msrb.mxu3 %v830_v48 }
  0x45   :  { %556 = vmatpush.bf16.msrb.mxu0 %v682_v52 }
  0x46   :  { %569 = vmatpush.bf16.msrb.mxu1 %v810_v53  ;;  %582 = vmatpush.bf16.msrb.mxu2 %v686_v58 }
  0x47   :  { %595 = vmatpush.bf16.msrb.mxu3 %v814_v63 }
  0x49   :  { %557 = vmatpush.bf16.msrb.mxu0 %v666_v9 }
  0x4a   :  { %570 = vmatpush.bf16.msrb.mxu1 %v794_v10  ;;  %583 = vmatpush.bf16.msrb.mxu2 %v670_v15 }
  0x4b   :  { %596 = vmatpush.bf16.msrb.mxu3 %v798_v21 }
  0x4e   :  { %571 = vmatpush.bf16.msrb.mxu1 %v778_v5 }
  0x4f   :  { %597 = vmatpush.bf16.msrb.mxu3 %v782_v34 }
  0x90   :  { %v72_v22 = vpop.xlane.xlu0 %71 }
  0x91   :  { %v80_v27 = vmul.f32 %v79_v12, %v72_v22  ;;  %v649_v12 = vld [vmem:[#allocation7 + $0x8] sm:$0xf]  ;;  %v896_v22 = vld [vmem:[#allocation7 + $0xc] sm:$0xf] }
  0x92   :  { %v654_v30 = vor.u32 %v896_v22, %v651_v23 }
  0x93   :  { %v1123_v33 = vadd.f32 1e-06, %v80_v27  ;;  %v650_v27 = vor.u32 %v898_v16, %v649_v12 }
  0x94   :  { %584 = vmatpush.bf16.msrb.mxu2 %v654_v30 }
  0x95   :  { %969 = vrsqrt.f32 %v1123_v33  ;;  %vm88_vm3 = vweird.f32 %v1123_v33  ;;  %558 = vmatpush.bf16.msrb.mxu0 %v650_v27 }
  0x9b   :  { %v970_v57 = vpop.eup %969 }
  0x9c   :  { %v83_v62 = vmul.f32 %v970_v57, %v1123_v33  ;;  %vm89_vm2 = vweird.f32 %v970_v57 }
  0x9d   :  { %vm90_vm4 = vmor %vm88_vm3, %vm89_vm2 }
  0x9e   :  { %v84_v8 = vmul.f32 %v970_v57, %v83_v62 }
  0xa0   :  { %v85_v20 = vmul.f32 0.5, %v84_v8 }
  0xa2   :  { %v86_v26 = vsub.f32 1.5, %v85_v20 }
  0xa4   :  { %v87_v32 = vmul.f32 %v970_v57, %v86_v26 }
  0xa6   :  { %v91_v35 = vsel %vm90_vm4, %v970_v57, %v87_v32 }
  0xa7   :  { %v96_v36 = vperm.slane %v91_v35, %v95_v29 }
  0xa9   :  { %v98_v38 = vmul.f32 %v96_v36, %v1110_v2 }
  0xab   :  { %v106_v39 = vmul.f32 %v104_v37, %v98_v38 }
  0xad   :  { %108 = vst [vmem:[#allocation1] ss:$2 sm:$0xff] %v106_v39 }
  0xb4   :  { %v109_v40 = vld.sshfl [vmem:[#allocation1] sm:$0xff pattern:$0x75316420]  ;;  %v110_v41 = vld.sshfl [vmem:[#allocation1 + $0x8] sm:$0xff pattern:$0x75316420] }
  0xb5   :  { %v113_v42 = vpack.c.bf16 %v109_v40, %v109_v40  ;;  %v114_v43 = vpack.c.bf16 %v110_v41, %v110_v41 }
  0xb7   :  { %507 = vmatmul.bf16.vlgmr.msra.gmra.mxu0 %v113_v42  ;;  %520 = vmatmul.bf16.vlgmr.msra.gmra.mxu1 %v114_v43 }
  0xb8   :  { %533 = vmatmul.bf16.vlgmr.msra.gmra.mxu2 %v113_v42  ;;  %546 = vmatmul.bf16.vlgmr.msra.gmra.mxu3 %v114_v43 }
  0xc7   :  { %559 = vmatmul.bf16.vlgmr.msrb.gmra.mxu0 %v113_v42  ;;  %572 = vmatmul.bf16.vlgmr.msrb.gmra.mxu1 %v114_v43 }
  0xc8   :  { %585 = vmatmul.bf16.vlgmr.msrb.gmra.mxu2 %v113_v42  ;;  %598 = vmatmul.bf16.vlgmr.msrb.gmra.mxu3 %v114_v43 }
 0x134   :  { %v508_v33 = vpop.f32.mrf.mxu0  ;;  %v521_v44 = vpop.f32.mrf.mxu1 }
 0x135   :  { %v522_v53 = vadd.f32 %v521_v44, %v508_v33 }
 0x13b   :  { %v534_v45 = vpop.f32.mrf.mxu2  ;;  %v547_v46 = vpop.f32.mrf.mxu3 }
 0x13c   :  { %v510_v47 = vpop.f32.mrf.mxu0  ;;  %v523_v2 = vpop.f32.mrf.mxu1  ;;  %v548_v52 = vadd.f32 %v547_v46, %v534_v45 }
 0x13e   :  { %v603_v54 = vpack.c.bf16 %v548_v52, %v522_v53 }
 0x140   :  { %v607_v61 = vrot.slane %v603_v54, 2 }
 0x142   :  { %v613_v1 = vsel %vm610_vm5, %v603_v54, %v607_v61 }
 0x143   :  { %v536_v48 = vpop.f32.mrf.mxu2  ;;  %v549_v49 = vpop.f32.mrf.mxu3 }
 0x144   :  { %v560_v50 = vpop.f32.mrf.mxu0  ;;  %v573_v51 = vpop.f32.mrf.mxu1 }
 0x145   :  { %v574_v57 = vadd.f32 %v573_v51, %v560_v50 }
 0x14b   :  { %v586_v55 = vpop.f32.mrf.mxu2  ;;  %v599_v56 = vpop.f32.mrf.mxu3 }
 0x14c   :  { %v600_v58 = vadd.f32 %v599_v56, %v586_v55  ;;  %v562_v59 = vpop.f32.mrf.mxu0  ;;  %v575_v60 = vpop.f32.mrf.mxu1 }
 0x14e   :  { %v604_v62 = vpack.c.bf16 %v600_v58, %v574_v57 }
 0x150   :  { %v608_v63 = vrot.slane %v604_v62, 4  ;;  %v609_v0 = vrot.slane %v604_v62, 6 }
 0x152   :  { %v617_v3 = vsel %vm614_vm6, %v608_v63, %v609_v0 }
 0x153   :  { %v588_v4 = vpop.f32.mrf.mxu2  ;;  %v601_v6 = vpop.f32.mrf.mxu3  ;;  %v618_v7 = vsel %vm67_vm0, %v613_v1, %v617_v3 }
 0x154   :  { %620 = vst [vmem:[#allocation8] sm:$0xff] %v618_v7 }
 0x155   :  { %631 = dma.vmem_to_hbm [thread:$0]  %s627_s2, 128, %s629_s30, [#allocation4]  }
 0x156   :  { %1071 = dma.done.wait [#allocation4], 128  }
 0x157   :  { %1072 = vsyncadd [#allocation4], 4294967168 }
 0x158   :  { %636 = vsyncpa [#allocation3], 1 }
 0x159   :  { %637 = vsyncpa [#allocation6], 1 }
 0x15a   :  { %638 = vsyncpa [#allocation4], 1 }

</bundles_post_ra>
